<compile_context>
chip_gen: v7x
topology: tpu7x:2x2x1
jax: 0.10.0
libtpu: 0.0.40
codegen_flags: <defaults>
</compile_context>

<pallas_src>
import jax
import jax.numpy as jnp
from jax.experimental import pallas as pl
from jax.experimental.pallas import tpu as pltpu


def mlp_kernel(x_ref, w1_ref, b1_ref, w2_ref, b2_ref, o_ref):
    """One batch tile of: relu(x @ W1 + b1) @ W2 + b2."""
    # Layer 1: MXU matmul with f32 accumulation; bias + ReLU on the VPU in f32.
    h = jnp.dot(x_ref[...], w1_ref[...], preferred_element_type=jnp.float32)
    h = jnp.maximum(h + b1_ref[...], 0.0)                       # [tb, Hp] + [1, Hp]
    # Layer 2: re-quantize the activation to the weight dtype for the MXU.
    o = jnp.dot(h.astype(w2_ref.dtype), w2_ref[...],
                preferred_element_type=jnp.float32)
    o_ref[...] = (o + b2_ref[...]).astype(o_ref.dtype)          # [tb, Cp] + [1, Cp]


def _round_up(n, m):
    return ((n + m - 1) // m) * m


def _pad2d(a, rows, cols, dtype):
    """Cast + zero-pad a 2-D array to (rows, cols); no copy if already aligned."""
    a = a.astype(dtype)
    pr, pc = rows - a.shape[0], cols - a.shape[1]
    if pr == 0 and pc == 0:
        return a
    return jnp.pad(a, ((0, pr), (0, pc)))


def mlp_forward(x, w1, b1, w2, b2, *, tb=256, compute_dtype=jnp.bfloat16):
    """Fused MLP forward: relu(x @ W1 + b1) @ W2 + b2.

    x: [B, F]; w1: [F, H]; b1: [H]; w2: [H, C]; b2: [C]  ->  [B, C] (x.dtype).
    Weights are stored as [in, out] (transposed vs torch.nn.Linear) so the
    kernel computes y = x @ W + b directly.
    """
    B, F = x.shape
    H = w1.shape[1]
    C = w2.shape[1]
    out_dtype = x.dtype

    # Lane-align the contraction / output dims; sublane-align the batch tile.
    F_pad = _round_up(F, 128)
    H_pad = _round_up(H, 128)
    C_pad = _round_up(C, 128)
    tb_eff = min(tb, _round_up(B, 8))
    B_pad = _round_up(B, tb_eff)

    # Zero padding is exact: padded x cols / W1 rows contribute 0, padded hidden
    # units have zero bias and zero W2 rows, padded batch rows are sliced off.
    xp = _pad2d(x, B_pad, F_pad, compute_dtype)
    w1p = _pad2d(w1, F_pad, H_pad, compute_dtype)
    w2p = _pad2d(w2, H_pad, C_pad, compute_dtype)
    b1p = _pad2d(b1.reshape(1, -1), 1, H_pad, jnp.float32)
    b2p = _pad2d(b2.reshape(1, -1), 1, C_pad, jnp.float32)

    in_bytes = jnp.dtype(compute_dtype).itemsize
    out_bytes = jnp.dtype(out_dtype).itemsize
    vmem_needed = (
        2 * tb_eff * F_pad * in_bytes                          # double-buffered x tile
        + 2 * (F_pad * H_pad + H_pad * C_pad) * in_bytes       # resident weights
        + 2 * (H_pad + C_pad) * 4                              # resident biases (f32)
        + 2 * tb_eff * C_pad * out_bytes                       # double-buffered out tile
        + tb_eff * (H_pad + C_pad) * 4)                        # in-kernel f32 intermediates
    # Headroom, clamped to the smallest per-TC VMEM across v5e/v6e/v7x (64 MiB on v7x).
    vmem_limit = int(min(64 * 1024 * 1024, max(2 * vmem_needed, 16 * 1024 * 1024)))

    cost = pl.CostEstimate(
        flops=2 * B_pad * (F_pad * H_pad + H_pad * C_pad),
        transcendentals=0,
        bytes_accessed=int(B_pad * F_pad * in_bytes
                           + (F_pad * H_pad + H_pad * C_pad) * in_bytes
                           + (H_pad + C_pad) * 4
                           + B_pad * C_pad * out_bytes))

    out = pl.pallas_call(
        mlp_kernel,
        out_shape=jax.ShapeDtypeStruct((B_pad, C_pad), out_dtype),
        grid_spec=pltpu.PrefetchScalarGridSpec(
            num_scalar_prefetch=0,
            grid=(B_pad // tb_eff,),
            in_specs=[
                pl.BlockSpec((tb_eff, F_pad), lambda i: (i, 0)),   # x tile (streamed)
                pl.BlockSpec((F_pad, H_pad), lambda i: (0, 0)),    # W1 (resident)
                pl.BlockSpec((1, H_pad), lambda i: (0, 0)),        # b1 (resident)
                pl.BlockSpec((H_pad, C_pad), lambda i: (0, 0)),    # W2 (resident)
                pl.BlockSpec((1, C_pad), lambda i: (0, 0)),        # b2 (resident)
            ],
            out_specs=pl.BlockSpec((tb_eff, C_pad), lambda i: (i, 0)),
        ),
        compiler_params=pltpu.CompilerParams(
            dimension_semantics=("parallel",),
            vmem_limit_bytes=vmem_limit,
        ),
        cost_estimate=cost,
    )(xp, w1p, b1p, w2p, b2p)

    return out[:B, :C]


def mlp_reference(x, w1, b1, w2, b2, compute_dtype=jnp.float32):
    """Pure-JAX reference mirroring the kernel's quantization points."""
    cd = compute_dtype
    h = jnp.dot(x.astype(cd), w1.astype(cd),
                preferred_element_type=jnp.float32) + b1.reshape(1, -1)
    h = jnp.maximum(h, 0.0)
    o = jnp.dot(h.astype(cd), w2.astype(cd),
                preferred_element_type=jnp.float32) + b2.reshape(1, -1)
    return o.astype(x.dtype)


if __name__ == "__main__":
    # Small, deliberately UNALIGNED shapes (exercise the padding paths) with a
    # multi-step batch grid: MLP(n_feats=20, n_hidden=48, n_classes=2), batch=300.
    B, n_feats, n_hidden, n_classes = 300, 20, 48, 2

    key = jax.random.PRNGKey(0)
    kx, kw1, kb1, kw2, kb2 = jax.random.split(key, 5)

    x = jax.random.normal(kx, (B, n_feats), dtype=jnp.float32)

    # Deterministic synthetic parameters (PyTorch-Linear-like uniform scale),
    # stored as [in, out] so the kernel computes x @ W + b directly.
    bound1 = 1.0 / jnp.sqrt(jnp.float32(n_feats))
    bound2 = 1.0 / jnp.sqrt(jnp.float32(n_hidden))
    w1 = jax.random.uniform(kw1, (n_feats, n_hidden), jnp.float32, -bound1, bound1)
    b1 = jax.random.uniform(kb1, (n_hidden,), jnp.float32, -bound1, bound1)
    w2 = jax.random.uniform(kw2, (n_hidden, n_classes), jnp.float32, -bound2, bound2)
    b2 = jax.random.uniform(kb2, (n_classes,), jnp.float32, -bound2, bound2)

    out = mlp_forward(x, w1, b1, w2, b2, tb=128, compute_dtype=jnp.bfloat16)
    out = jax.block_until_ready(out)
    assert out.shape == (B, n_classes), out.shape
    assert out.dtype == x.dtype, out.dtype

    # Check vs a reference that mirrors the bf16 quantization points ...
    ref_bf16 = mlp_reference(x, w1, b1, w2, b2, compute_dtype=jnp.bfloat16)
    assert jnp.allclose(out, ref_bf16, atol=2e-2, rtol=2e-2), "mismatch vs bf16 reference"
    # ... and vs the exact f32 forward with a bf16-appropriate tolerance.
    ref_f32 = mlp_reference(x, w1, b1, w2, b2, compute_dtype=jnp.float32)
    assert jnp.allclose(out, ref_f32, atol=5e-2, rtol=5e-2), "mismatch vs f32 reference"

    print("KERNEL_OK")
</pallas_src>

<mosaic_0001>
module attributes {stable_mosaic.version = 11 : i64} {
  func.func @mlp_kernel(%arg0: i32, %arg1: memref<128x128xbf16, #tpu.memory_space<vmem>>, %arg2: memref<128x128xbf16, #tpu.memory_space<vmem>>, %arg3: memref<1x128xf32, #tpu.memory_space<vmem>>, %arg4: memref<128x128xbf16, #tpu.memory_space<vmem>>, %arg5: memref<1x128xf32, #tpu.memory_space<vmem>>, %arg6: memref<128x128xf32, #tpu.memory_space<vmem>>) attributes {dimension_semantics = [#tpu.dimension_semantics<parallel>], iteration_bounds = array<i64: 3>, scalar_prefetch = 0 : i64, scratch_operands = 0 : i64, tpu.core_type = #tpu.core_type<tc>, window_params = [{transform_indices = @transform_0, window_bounds = array<i64: 128, 128>}, {pipeline_mode = #tpu.pipeline_mode<synchronous>, transform_indices = @transform_1, window_bounds = array<i64: 128, 128>}, {pipeline_mode = #tpu.pipeline_mode<synchronous>, transform_indices = @transform_2, window_bounds = array<i64: 1, 128>}, {pipeline_mode = #tpu.pipeline_mode<synchronous>, transform_indices = @transform_3, window_bounds = array<i64: 128, 128>}, {pipeline_mode = #tpu.pipeline_mode<synchronous>, transform_indices = @transform_4, window_bounds = array<i64: 1, 128>}, {transform_indices = @transform_5, window_bounds = array<i64: 128, 128>}]} {
    %c0 = arith.constant 0 : index
    %c0_0 = arith.constant 0 : index
    %0 = vector.load %arg1[%c0, %c0_0] : memref<128x128xbf16, #tpu.memory_space<vmem>>, vector<128x128xbf16>
    %c0_1 = arith.constant 0 : index
    %c0_2 = arith.constant 0 : index
    %1 = vector.load %arg2[%c0_1, %c0_2] : memref<128x128xbf16, #tpu.memory_space<vmem>>, vector<128x128xbf16>
    %cst = arith.constant dense<0.000000e+00> : vector<128x128xf32>
    %2 = tpu.matmul %0, %1, %cst {dimension_numbers = #tpu.dot_dimension_numbers<[1], [0], [0], [1], [0, 0, 1, 1], [], []>} : vector<128x128xbf16>, vector<128x128xbf16>, vector<128x128xf32> -> vector<128x128xf32>
    %c0_3 = arith.constant 0 : index
    %c0_4 = arith.constant 0 : index
    %3 = vector.load %arg3[%c0_3, %c0_4] : memref<1x128xf32, #tpu.memory_space<vmem>>, vector<1x128xf32>
    %4 = vector.broadcast %3 : vector<1x128xf32> to vector<128x128xf32>
    %5 = arith.addf %2, %4 : vector<128x128xf32>
    %cst_5 = arith.constant 0.000000e+00 : f32
    %6 = vector.broadcast %cst_5 : f32 to vector<128x128xf32>
    %7 = arith.maximumf %5, %6 : vector<128x128xf32>
    %8 = arith.truncf %7 : vector<128x128xf32> to vector<128x128xbf16>
    %c0_6 = arith.constant 0 : index
    %c0_7 = arith.constant 0 : index
    %9 = vector.load %arg4[%c0_6, %c0_7] : memref<128x128xbf16, #tpu.memory_space<vmem>>, vector<128x128xbf16>
    %cst_8 = arith.constant dense<0.000000e+00> : vector<128x128xf32>
    %10 = tpu.matmul %8, %9, %cst_8 {dimension_numbers = #tpu.dot_dimension_numbers<[1], [0], [0], [1], [0, 0, 1, 1], [], []>} : vector<128x128xbf16>, vector<128x128xbf16>, vector<128x128xf32> -> vector<128x128xf32>
    %c0_9 = arith.constant 0 : index
    %c0_10 = arith.constant 0 : index
    %11 = vector.load %arg5[%c0_9, %c0_10] : memref<1x128xf32, #tpu.memory_space<vmem>>, vector<1x128xf32>
    %12 = vector.broadcast %11 : vector<1x128xf32> to vector<128x128xf32>
    %13 = arith.addf %10, %12 : vector<128x128xf32>
    %c0_11 = arith.constant 0 : index
    %c0_12 = arith.constant 0 : index
    %14 = vector.load %arg6[%c0_11, %c0_12] : memref<128x128xf32, #tpu.memory_space<vmem>>, vector<128x128xf32>
    tpu.vector_store %arg6[%c0_11, %c0_12], %13 {strides = array<i32>} : memref<128x128xf32, #tpu.memory_space<vmem>>, vector<128x128xf32>,
    return
  }
  func.func @transform_0(%arg0: i32) -> (i32, i32) {
    %c0_i32 = arith.constant 0 : i32
    %c0_i32_0 = arith.constant 0 : i32
    return %arg0, %c0_i32 : i32, i32
  }
  func.func @transform_1(%arg0: i32) -> (i32, i32) {
    %c0_i32 = arith.constant 0 : i32
    %c0_i32_0 = arith.constant 0 : i32
    %c0_i32_1 = arith.constant 0 : i32
    return %c0_i32, %c0_i32_0 : i32, i32
  }
  func.func @transform_2(%arg0: i32) -> (i32, i32) {
    %c0_i32 = arith.constant 0 : i32
    %c0_i32_0 = arith.constant 0 : i32
    %c0_i32_1 = arith.constant 0 : i32
    return %c0_i32, %c0_i32_0 : i32, i32
  }
  func.func @transform_3(%arg0: i32) -> (i32, i32) {
    %c0_i32 = arith.constant 0 : i32
    %c0_i32_0 = arith.constant 0 : i32
    %c0_i32_1 = arith.constant 0 : i32
    return %c0_i32, %c0_i32_0 : i32, i32
  }
  func.func @transform_4(%arg0: i32) -> (i32, i32) {
    %c0_i32 = arith.constant 0 : i32
    %c0_i32_0 = arith.constant 0 : i32
    %c0_i32_1 = arith.constant 0 : i32
    return %c0_i32, %c0_i32_0 : i32, i32
  }
  func.func @transform_5(%arg0: i32) -> (i32, i32) {
    %c0_i32 = arith.constant 0 : i32
    %c0_i32_0 = arith.constant 0 : i32
    return %arg0, %c0_i32 : i32, i32
  }
}

</mosaic_0001>

<bundles_post_ra>
// kernel: tpu_custom_call.1
= control target key start
LH: loop header
LB: loop body
LE: loop exit
PB: predicated region body
PF: predicated region fallthrough
CT: control target
= control target key end

     0   :  { %10 = vsyncpa [#allocation3], 0  ;;  %s1524_s0 = inlined_call_operand.hbm [shape: bf16[384,128], index: 0, kind: input, shape index: {}]   ;;  %s1525_s1 = inlined_call_operand.hbm [shape: bf16[128,128], index: 1, kind: input, shape index: {}]   ;;  %s1526_s2 = inlined_call_operand.vmem [shape: f32[1,128], index: 2, kind: input, shape index: {}]   ;;  %s1527_s3 = inlined_call_operand.hbm [shape: bf16[128,128], index: 3, kind: input, shape index: {}]   ;;  %s1528_s4 = inlined_call_operand.vmem [shape: f32[1,128], index: 4, kind: input, shape index: {}]   ;;  %s1529_s5 = inlined_call_operand.hbm [shape: f32[384,128], index: 5, kind: output, shape index: {}]  }
   0x1   :  { %12 = vsyncpa [#allocation3 + $0x1], 0 }
   0x2   :  { %13 = vsyncpa [#allocation6], 0 }
   0x3   :  { %14 = vsyncpa [#allocation4], 0 }
   0x4   :  { %16 = vsyncpa [#allocation4 + $0x1], 0  ;;  %s1254_s18 = smov 0   ;;  %s1256_s19 = smov 0  }
   0x5   :  { %s1258_s20 = smov 0   ;;  %s1260_s21 = smov 0  }
   0x6 LB: > { %s1275_s22 = sadd.s32 4294967295, %s1214_s21   ;;  %s821_s23 = sadd.s32 4294967294, %s1214_s21   ;;  %s1214_s21 = sphi %s1260_s21, %s1548_s21   ;;  %s1210_s20 = sphi %s1258_s20, %s1547_s20   ;;  %s1206_s19 = sphi %s1256_s19, %s1546_s19   ;;  %s1202_s18 = sphi %s1254_s18, %s1545_s18  }
   0x7   : > { %p42_p0 = scmp.ne.s32.totalorder %s1206_s19, %s1202_s18  ;;  %p1530_p1 = scmp.eq.s32.totalorder %s1275_s22, 0 }
   0x8   : > { %p156_p3 = scmp.eq.s32.totalorder %s821_s23, 2  ;;  %p822_p5 = scmp.ge.s32.totalorder %s1214_s21, 1 }
   0x9   : > { %p1284_p4 = por %p1530_p1, %p42_p0  ;;  %p163_p7 = scmp.lt.s32.totalorder %s1214_s21, 4 }
   0xa   : > { %p1289_p6 = por %p156_p3, %p42_p0  ;;  %s1216_s27 = smov [#allocation5]  }
   0xb   : > { %s1533_s24 = scalar_select %p1284_p4, 1, 0 }
   0xc   : > { %s1534_s25 = scalar_select %p1289_p6, 1, 0 }
   0xd   : > { %p1294_p8 = pnand %p822_p5, %p163_p7  ;;  %s175_s28 = sshll.u32 %s1216_s27, 4  ;;  %s176_s28 = int_to_ptr.vmem [resolvable:$true] %s175_s28 }
   0xe   : > { %s1217_s30 = smov [#allocation7]   ;;  %s1058_s9 = scalar_lea.hbm %s1525_s1, 1024 }
   0xf   : > { %s1535_s26 = scalar_select %p1294_p8, 1, 0 }
  0x10   : > { %p975_p9 = pneg %p1294_p8  ;;  %s191_s6 = sshll.u32 %s1217_s30, 4  ;;  %s1306_s6 = int_to_ptr.vmem [resolvable:$true] %s191_s6 }
  0x11   : > { %p1059_p11 = scmp.ne.s32.totalorder %s1525_s1, %s1058_s9  ;;  %p1065_p3 = scmp.lt.u32.totalorder %s1058_s9, %s1525_s1 }
  0x12   : > { %p1302_p10 = pnand %p975_p9, %p1530_p1 }
  0x14   : > { %p1060_p12 = pneg %p1302_p10 }
  0x16   : > { %p1061_p13 = pnand %p1060_p12, %p1059_p11 }
  0x18   : > { %p1062_p0 = pneg %p1061_p13 }
  0x1a   : > { %p1067_p5 = pnand %p1065_p3, %p1062_p0 }
  0x1c   : > { %1070 = shalt.err (!%p1067_p5)
}
  0x1d   : > { %s1071_s14 = scalar_lea.vmem %s176_s28, 1024  ;;  %p1079_p2 = scmp.lt.s32.totalorder %s176_s28, %s176_s28 }
  0x1e   : > { %p1072_p7 = scmp.ne.s32.totalorder %s176_s28, %s1071_s14  ;;  %p1080_p6 = scmp.lt.s32.totalorder %s1071_s14, %s1071_s14 }
  0x20   : > { %p1074_p9 = pnand %p1072_p7, %p1060_p12  ;;  %p1081_p4 = por %p1080_p6, %p1079_p2 }
  0x22   : > { %p1075_p1 = pneg %p1074_p9 }
  0x24   : > { %p1082_p8 = pnand %p1081_p4, %p1075_p1 }
  0x26   : > { %1085 = shalt.err (!%p1082_p8)
}
  0x27   : > { %s1218_s15 = smov 64   ;;  %s1219_s16 = smov 4  }
  0x28   : > { %978 = dma.hbm_to_vmem [thread:$0]  (!%p1302_p10), %s1525_s1, 1024, %s176_s28, [#allocation6], %s1218_s15, %s1218_s15, %s1219_s16  }
  0x29   : > { %s1086_s7 = scalar_lea.hbm %s1527_s3, 1024 }
  0x2a   : > { %p1087_p1 = scmp.ne.s32.totalorder %s1527_s3, %s1086_s7  ;;  %p1093_p6 = scmp.lt.u32.totalorder %s1086_s7, %s1527_s3 }
  0x2c   : > { %p1089_p2 = pnand %p1087_p1, %p1060_p12 }
  0x2e   : > { %p1090_p4 = pneg %p1089_p2 }
  0x30   : > { %p1095_p8 = pnand %p1093_p6, %p1090_p4 }
  0x32   : > { %1098 = shalt.err (!%p1095_p8)
}
  0x33   : > { %s1099_s28 = scalar_lea.vmem %s1306_s6, 1024  ;;  %p1107_p3 = scmp.lt.s32.totalorder %s1306_s6, %s1306_s6 }
  0x34   : > { %p1100_p11 = scmp.ne.s32.totalorder %s1306_s6, %s1099_s28  ;;  %p1108_p5 = scmp.lt.s32.totalorder %s1099_s28, %s1099_s28 }
  0x36   : > { %p1102_p13 = pnand %p1100_p11, %p1060_p12  ;;  %p1109_p7 = por %p1108_p5, %p1107_p3 }
  0x38   : > { %p1103_p0 = pneg %p1102_p13 }
  0x3a   : > { %p1110_p9 = pnand %p1109_p7, %p1103_p0 }
  0x3c   : > { %1113 = shalt.err (!%p1110_p9)
}
  0x3d   : > { %981 = dma.hbm_to_vmem [thread:$0]  (!%p1302_p10), %s1527_s3, 1024, %s1306_s6, [#allocation6], %s1218_s15, %s1218_s15, %s1219_s16  }
  0x3e   : > { %s1362_s29 = sadd.s32 1, %s1214_s21   ;;  %s29_s14 = sadd.s32 1, %s1210_s20 }
  0x3f   : > { %s26_s17 = ssub.s32 %s1214_s21, %s1362_s29  ;;  %p36_p12 = scmp.ne.s32.totalorder %s1210_s20, %s1206_s19 }
  0x40   : > { %p27_p1 = scmp.eq.s32.totalorder %s26_s17, 0  ;;  %p37_p2 = scmp.eq.s32.totalorder %s1214_s21, 0 }
  0x41   : > { %p1537_p4 = scmp.eq.s32.totalorder %s1275_s22, 2  ;;  %p992_p8 = scmp.lt.s32.totalorder %s1214_s21, 3 }
  0x42   : > { %s1378_s27 = scalar_select %p27_p1, %s1210_s20, %s29_s14  }
  0x43   : > { %p1372_p6 = por %p1537_p4, %p36_p12  ;;  %p38_p11 = por %p37_p2, %p36_p12 }
  0x44   : > { %s208_s30 = sand.u32 1, %s1210_s20   ;;  %s865_s6 = sshll.u32 %s1214_s21, 10 }
  0x45   : > { %s826_s7 = sshll.u32 %s208_s30, 6  ;;  %s1385_s10 = scalar_lea.hbm %s1524_s0, %s865_s6 }
  0x46   : > { %s212_s11 = scalar_lea.vmem [#allocation2], %s826_s7  ;;  %p1389_p10 = pnand %p992_p8, %p38_p11 }
  0x47   : > { %s219_s28 = sshll.u32 %s212_s11, 4  ;;  %s1393_s13 = scalar_lea.sflag [#allocation3], %s208_s30  ;;  %s1387_s28 = int_to_ptr.vmem [resolvable:$true] %s219_s28 }
  0x48   : > { %s1114_s14 = scalar_lea.hbm %s1385_s10, 1024  ;;  %p1116_p0 = pneg %p1389_p10 }
  0x49   : > { %p1115_p13 = scmp.ne.s32.totalorder %s1385_s10, %s1114_s14  ;;  %s1119_s6 = scalar_lea.hbm %s1524_s0, 3072 }
  0x4a   : > { %p1120_p7 = scmp.lt.u32.totalorder %s1385_s10, %s1524_s0  ;;  %p1121_p9 = scmp.lt.u32.totalorder %s1119_s6, %s1114_s14 }
  0x4b   : > { %p1117_p3 = pnand %p1116_p0, %p1115_p13  ;;  %p1123_p1 = scmp.lt.u32.totalorder %s1114_s14, %s1385_s10 }
  0x4c   : > { %p1122_p12 = por %p1121_p9, %p1120_p7 }
  0x4d   : > { %p1118_p5 = pneg %p1117_p3 }
  0x4e   : > { %p1124_p2 = por %p1123_p1, %p1122_p12 }
  0x50   : > { %p1125_p4 = pnand %p1124_p2, %p1118_p5 }
  0x52   : > { %1128 = shalt.err (!%p1125_p4)
}
  0x53   : > { %s1129_s30 = scalar_lea.vmem %s1387_s28, 1024  ;;  %s1220_s11 = smov [#allocation2]  }
  0x54   : > { %p1130_p8 = scmp.ne.s32.totalorder %s1387_s28, %s1129_s30  ;;  %s1134_s17 = sshll.u32 %s1220_s11, 4  ;;  %s1135_s17 = int_to_ptr.vmem [resolvable:$false] %s1134_s17 }
  0x55   : > { %s1136_s7 = scalar_lea.vmem %s1135_s17, 2048  ;;  %p1137_p3 = scmp.lt.s32.totalorder %s1387_s28, %s1135_s17 }
  0x56   : > { %p1132_p11 = pnand %p1130_p8, %p1116_p0  ;;  %p1138_p7 = scmp.lt.s32.totalorder %s1136_s7, %s1129_s30 }
  0x58   : > { %p1133_p13 = pneg %p1132_p11  ;;  %p1139_p9 = por %p1138_p7, %p1137_p3 }
  0x5a   : > { %p1140_p12 = pnand %p1139_p9, %p1133_p13 }
  0x5c   : > { %1143 = shalt.err (!%p1140_p12)
}
  0x5d   : > { %985 = dma.hbm_to_vmem [thread:$0]  (!%p1389_p10), %s1385_s10, 1024, %s1387_s28, %s1393_s13, %s1218_s15, %s1218_s15, %s1219_s16  }
  0x5e   : > { %p1540_p0 = scmp.ne.s32.totalorder %s1535_s26, 0 }
  0x5f   : > { %s1427_s14 = sand.u32 (!%p1540_p0), 1, %s1206_s19   ;;  %p1541_p5 = scmp.ne.s32.totalorder (!%p1540_p0), %s1533_s24, 0 }
  0x60   : > { %231 = sbr.rel (%p1540_p0) target bundleno = 618 (0x26a), region = 40  ;;  %s830_s6 = sshll.u32 (!%p1540_p0), %s1427_s14, 6 }
  0x61   : > { %s234_s8 = scalar_lea.sflag (!%p1540_p0), [#allocation3], %s1427_s14  ;;  %s1431_s9 = scalar_lea.vmem (!%p1540_p0), [#allocation2], %s830_s6 }
  0x67   : > { %1189 = dma.done.wait (%p1541_p5), %s234_s8, 1024  }
  0x68   : > { %1191 = vsyncadd (%p1541_p5), %s234_s8, 4294966272  ;;  %p1542_p10 = scmp.eq.s32.totalorder %s1275_s22, 0 }
  0x6a   : > { %1193 = dma.done.wait (%p1542_p10), [#allocation6], 2048   ;;  %p1543_p1 = pmov %p1542_p10 }
  0x6b   : > { %v1034_v0 = vld [vmem:[#allocation5] sm:$0xff]   ;;  %v1035_v1 = vld [vmem:[#allocation5 + $0x8] sm:$0xff]   ;;  %v1036_v2 = vld [vmem:[#allocation5 + $0x10] sm:$0xff]   ;;  %s833_s15 = sshll.u32 %s1427_s14, 7  ;;  %s866_s12 = sshll.u32 %s1275_s22, 11 }
  0x6c   : > { %1195 = vsyncadd (%p1543_p1), [#allocation6], 4294965248  ;;  %899 = vmatprep.subr.bf16.mxu0 %v1034_v0  ;;  %v1037_v3 = vld [vmem:[#allocation5 + $0x18] sm:$0xff]   ;;  %v1042_v4 = vld [vmem:[%s1431_s9] sm:$0xff]   ;;  %s1456_s28 = scalar_lea.vmem [#allocation8], %s833_s15  ;;  %s1476_s17 = scalar_lea.hbm %s1529_s5, %s866_s12 }
  0x6d   : > { %900 = vmatpush3.bf16.msra.mxu0 %v1034_v0  ;;  %915 = vmatprep.mubr.bf16.mxu0 %v1042_v4  ;;  %v1038_v5 = vld [vmem:[#allocation5 + $0x20] sm:$0xff]   ;;  %v1039_v6 = vld [vmem:[#allocation5 + $0x28] sm:$0xff]   ;;  %v1040_v9 = vld [vmem:[#allocation5 + $0x30] sm:$0xff]   ;;  %s729_s13 = sshll.u32 %s1456_s28, 4  ;;  %s716_s22 = scalar_lea.sflag [#allocation4], %s1427_s14  ;;  %s1478_s13 = int_to_ptr.vmem [resolvable:$true] %s729_s13 }
  0x6e   : > { %901 = vmatprep.subr.bf16.mxu0 %v1035_v1  ;;  %v1050_v7 = vld [vmem:[#allocation7] sm:$0xff]   ;;  %v1051_v8 = vld [vmem:[#allocation7 + $0x8] sm:$0xff]   ;;  %v1052_v10 = vld [vmem:[#allocation7 + $0x10] sm:$0xff]   ;;  %s1144_s7 = scalar_lea.vmem %s1478_s13, 2048  ;;  %s1221_s6 = smov [#allocation8]  }
  0x6f   : > { %931 = vmatprep.subr.bf16.mxu1 %v1050_v7  ;;  %v1041_v11 = vld [vmem:[#allocation5 + $0x38] sm:$0xff]   ;;  %v1054_v13 = vld [vmem:[#allocation7 + $0x20] sm:$0xff]   ;;  %v1043_v14 = vld [vmem:[%s1431_s9 + $0x8] sm:$0xff]   ;;  %p1145_p2 = scmp.ne.s32.totalorder %s1478_s13, %s1144_s7  ;;  %s1148_s8 = sshll.u32 %s1221_s6, 4  ;;  %s1149_s8 = int_to_ptr.vmem [resolvable:$false] %s1148_s8 }
  0x70   : > { %932 = vmatpush3.bf16.msra.mxu1 %v1050_v7  ;;  %v1053_v12 = vld [vmem:[#allocation7 + $0x18] sm:$0xff]   ;;  %v1044_v15 = vld [vmem:[%s1431_s9 + $0x10] sm:$0xff]   ;;  %v1055_v16 = vld [vmem:[#allocation7 + $0x28] sm:$0xff]   ;;  %p1151_p11 = scmp.lt.s32.totalorder %s1478_s13, %s1149_s8 }
  0x71   : > { %902 = vmatpush3.bf16.msra.mxu0 %v1035_v1  ;;  %933 = vmatprep.subr.bf16.mxu1 %v1051_v8  ;;  %v1045_v17 = vld [vmem:[%s1431_s9 + $0x18] sm:$0xff]   ;;  %v1046_v18 = vld [vmem:[%s1431_s9 + $0x20] sm:$0xff]   ;;  %v1047_v19 = vld [vmem:[%s1431_s9 + $0x28] sm:$0xff]   ;;  %p1146_p4 = pnand %p1145_p2, %p1372_p6 }
  0x72   : > { %903 = vmatprep.subr.bf16.mxu0 %v1036_v2  ;;  %v1048_v20 = vld [vmem:[%s1431_s9 + $0x30] sm:$0xff]   ;;  %v1049_v21 = vld [vmem:[%s1431_s9 + $0x38] sm:$0xff]   ;;  %v834_v24 = vld [vmem:[%s1526_s2] ss:$0 sm:$0xff]  ;;  %s1150_s9 = scalar_lea.vmem %s1149_s8, 4096 }
  0x73   : > { %v1056_v22 = vld [vmem:[#allocation7 + $0x30] sm:$0xff]   ;;  %v1057_v23 = vld [vmem:[#allocation7 + $0x38] sm:$0xff]   ;;  %p1147_p8 = pneg %p1146_p4  ;;  %p1152_p13 = scmp.lt.s32.totalorder %s1150_s9, %s1144_s7 }
  0x74   : > { %934 = vmatpush3.bf16.msra.mxu1 %v1051_v8 }
  0x75   : > { %904 = vmatpush3.bf16.msra.mxu0 %v1036_v2  ;;  %935 = vmatprep.subr.bf16.mxu1 %v1052_v10  ;;  %p1153_p3 = por %p1152_p13, %p1151_p11 }
  0x76   : > { %905 = vmatprep.subr.bf16.mxu0 %v1037_v3 }
  0x77   : > { %p1154_p7 = pnand %p1153_p3, %p1147_p8 }
  0x78   : > { %936 = vmatpush3.bf16.msra.mxu1 %v1052_v10 }
  0x79   : > { %906 = vmatpush3.bf16.msra.mxu0 %v1037_v3  ;;  %937 = vmatprep.subr.bf16.mxu1 %v1053_v12 }
  0x7a   : > { %907 = vmatprep.subr.bf16.mxu0 %v1038_v5 }
  0x7c   : > { %938 = vmatpush3.bf16.msra.mxu1 %v1053_v12 }
  0x7d   : > { %908 = vmatpush3.bf16.msra.mxu0 %v1038_v5  ;;  %939 = vmatprep.subr.bf16.mxu1 %v1054_v13 }
  0x7e   : > { %909 = vmatprep.subr.bf16.mxu0 %v1039_v6 }
  0x80   : > { %940 = vmatpush3.bf16.msra.mxu1 %v1054_v13 }
  0x81   : > { %910 = vmatpush3.bf16.msra.mxu0 %v1039_v6  ;;  %941 = vmatprep.subr.bf16.mxu1 %v1055_v16 }
  0x82   : > { %911 = vmatprep.subr.bf16.mxu0 %v1040_v9 }
  0x84   : > { %942 = vmatpush3.bf16.msra.mxu1 %v1055_v16 }
  0x85   : > { %912 = vmatpush3.bf16.msra.mxu0 %v1040_v9  ;;  %943 = vmatprep.subr.bf16.mxu1 %v1056_v22 }
  0x86   : > { %913 = vmatprep.subr.bf16.mxu0 %v1041_v11 }
  0x88   : > { %944 = vmatpush3.bf16.msra.mxu1 %v1056_v22 }
  0x89   : > { %914 = vmatpush3.bf16.msra.mxu0 %v1041_v11  ;;  %945 = vmatprep.subr.bf16.mxu1 %v1057_v23 }
  0x8c   : > { %916 = vmatmul.mubr.bf16.vlgmr.msra.gmra.mrb[0].mxu0 %v1043_v14  ;;  %946 = vmatpush3.bf16.msra.mxu1 %v1057_v23 }
  0x8d   : > { %919 = vmatprep.mubr.bf16.mxu0 %v1044_v15 }
  0x94   : > { %920 = vmatmul.mubr.bf16.gmra.mrb[4].mxu0 %v1045_v17  ;;  %v851_v17 = vld [vmem:[%s1528_s4] ss:$0 sm:$0xff] }
  0x95   : > { %923 = vmatprep.mubr.bf16.mxu0 %v1046_v18 }
  0x9c   : > { %924 = vmatmul.mubr.bf16.gmra.mrb[8].mxu0 %v1047_v19 }
  0x9d   : > { %927 = vmatprep.mubr.bf16.mxu0 %v1048_v20 }
  0xa4   : > { %928 = vmatmul.mubr.bf16.gmra.mrb[12].mxu0 %v1049_v21 }
 0x15f   : > { %v917_v25 = vpop.f32.mrb[0].mxu0 }
 0x160   : > { %v453_v26 = vadd.f32 %v917_v25, %v834_v24  ;;  %v444_v27 = vpop.f32.mrb[1].mxu0 }
 0x161   : > { %v445_v28 = vadd.f32 %v834_v24, %v444_v27  ;;  %v918_v29 = vpop.f32.mrb[2].mxu0 }
 0x162   : > { %v456_v30 = vadd.f32 %v918_v29, %v834_v24  ;;  %v447_v31 = vpop.f32.mrb[3].mxu0  ;;  %v509_v33 = vmax.f32 %v453_v26, 0.0 }
 0x163   : > { %v448_v32 = vadd.f32 %v834_v24, %v447_v31  ;;  %v507_v35 = vmax.f32 %v445_v28, 0.0 }
 0x164   : > { %v510_v34 = vmax.f32 %v456_v30, 0.0 }
 0x165   : > { %v508_v36 = vmax.f32 %v448_v32, 0.0 }
 0x166   : > { %v524_v37 = vpack.c.bf16 %v510_v34, %v509_v33 }
 0x167   : > { %v921_v38 = vpop.f32.mrb[4].mxu0  ;;  %v523_v39 = vpack.c.bf16 %v508_v36, %v507_v35 }
 0x168   : > { %v469_v40 = vadd.f32 %v921_v38, %v834_v24  ;;  %v460_v41 = vpop.f32.mrb[5].mxu0 }
 0x169   : > { %v461_v42 = vadd.f32 %v834_v24, %v460_v41  ;;  %v922_v43 = vpop.f32.mrb[6].mxu0  ;;  %947 = vmatprep.mubr.bf16.mxu1 %v523_v39 }
 0x16a   : > { %v472_v44 = vadd.f32 %v922_v43, %v834_v24  ;;  %v463_v45 = vpop.f32.mrb[7].mxu0  ;;  %948 = vmatmul.mubr.bf16.vlgmr.msra.gmra.mrb[0].mxu1 %v524_v37  ;;  %v513_v47 = vmax.f32 %v469_v40, 0.0 }
 0x16b   : > { %v464_v46 = vadd.f32 %v834_v24, %v463_v45  ;;  %v511_v49 = vmax.f32 %v461_v42, 0.0 }
 0x16c   : > { %v514_v48 = vmax.f32 %v472_v44, 0.0 }
 0x16d   : > { %v512_v50 = vmax.f32 %v464_v46, 0.0 }
 0x16e   : > { %v526_v51 = vpack.c.bf16 %v514_v48, %v513_v47 }
 0x16f   : > { %v525_v52 = vpack.c.bf16 %v512_v50, %v511_v49  ;;  %v925_v53 = vpop.f32.mrb[8].mxu0 }
 0x170   : > { %v485_v54 = vadd.f32 %v925_v53, %v834_v24  ;;  %v476_v55 = vpop.f32.mrb[9].mxu0 }
 0x171   : > { %v477_v56 = vadd.f32 %v834_v24, %v476_v55  ;;  %v926_v57 = vpop.f32.mrb[10].mxu0  ;;  %951 = vmatprep.mubr.bf16.mxu1 %v525_v52 }
 0x172   : > { %v488_v58 = vadd.f32 %v926_v57, %v834_v24  ;;  %v479_v59 = vpop.f32.mrb[11].mxu0  ;;  %952 = vmatmul.mubr.bf16.gmra.mrb[4].mxu1 %v526_v51  ;;  %v517_v61 = vmax.f32 %v485_v54, 0.0 }
 0x173   : > { %v480_v60 = vadd.f32 %v834_v24, %v479_v59  ;;  %v515_v63 = vmax.f32 %v477_v56, 0.0 }
 0x174   : > { %v518_v62 = vmax.f32 %v488_v58, 0.0 }
 0x175   : > { %v516_v0 = vmax.f32 %v480_v60, 0.0 }
 0x176   : > { %v528_v1 = vpack.c.bf16 %v518_v62, %v517_v61 }
 0x177   : > { %v527_v2 = vpack.c.bf16 %v516_v0, %v515_v63  ;;  %v929_v3 = vpop.f32.mrb[12].mxu0 }
 0x178   : > { %v501_v4 = vadd.f32 %v929_v3, %v834_v24  ;;  %v492_v5 = vpop.f32.mrb[13].mxu0 }
 0x179   : > { %v493_v6 = vadd.f32 %v834_v24, %v492_v5  ;;  %v930_v7 = vpop.f32.mrb[14].mxu0  ;;  %955 = vmatprep.mubr.bf16.mxu1 %v527_v2 }
 0x17a   : > { %v504_v8 = vadd.f32 %v930_v7, %v834_v24  ;;  %v495_v9 = vpop.f32.mrb[15].mxu0  ;;  %956 = vmatmul.mubr.bf16.gmra.mrb[8].mxu1 %v528_v1  ;;  %v521_v11 = vmax.f32 %v501_v4, 0.0 }
 0x17b   : > { %v496_v10 = vadd.f32 %v834_v24, %v495_v9  ;;  %v519_v13 = vmax.f32 %v493_v6, 0.0 }
 0x17c   : > { %v522_v12 = vmax.f32 %v504_v8, 0.0 }
 0x17d   : > { %v520_v14 = vmax.f32 %v496_v10, 0.0 }
 0x17e   : > { %v530_v15 = vpack.c.bf16 %v522_v12, %v521_v11 }
 0x17f   : > { %v529_v16 = vpack.c.bf16 %v520_v14, %v519_v13 }
 0x181   : > { %959 = vmatprep.mubr.bf16.mxu1 %v529_v16 }
 0x182   : > { %960 = vmatmul.mubr.bf16.gmra.mrb[12].mxu1 %v530_v15 }
 0x23d   : > { %v949_v18 = vpop.f32.mrb[0].mxu1 }
 0x23e   : > { %v645_v19 = vadd.f32 %v949_v18, %v851_v17  ;;  %v636_v20 = vpop.f32.mrb[1].mxu1 }
 0x23f   : > { %v637_v21 = vadd.f32 %v851_v17, %v636_v20  ;;  %v950_v22 = vpop.f32.mrb[2].mxu1 }
 0x240   : > { %701 = vst [vmem:[%s1456_s28 + $0x10] sm:$0xff] %v645_v19  ;;  %v648_v23 = vadd.f32 %v950_v22, %v851_v17  ;;  %v639_v24 = vpop.f32.mrb[3].mxu1 }
 0x241   : > { %699 = vst [vmem:[%s1456_s28] sm:$0xff] %v637_v21  ;;  %v640_v25 = vadd.f32 %v851_v17, %v639_v24 }
 0x242   : > { %702 = vst [vmem:[%s1456_s28 + $0x18] sm:$0xff] %v648_v23 }
 0x243   : > { %700 = vst [vmem:[%s1456_s28 + $0x8] sm:$0xff] %v640_v25 }
 0x245   : > { %v953_v26 = vpop.f32.mrb[4].mxu1 }
 0x246   : > { %v661_v27 = vadd.f32 %v953_v26, %v851_v17  ;;  %v652_v28 = vpop.f32.mrb[5].mxu1 }
 0x247   : > { %v653_v29 = vadd.f32 %v851_v17, %v652_v28  ;;  %v954_v30 = vpop.f32.mrb[6].mxu1 }
 0x248   : > { %705 = vst [vmem:[%s1456_s28 + $0x30] sm:$0xff] %v661_v27  ;;  %v664_v31 = vadd.f32 %v954_v30, %v851_v17  ;;  %v655_v32 = vpop.f32.mrb[7].mxu1 }
 0x249   : > { %703 = vst [vmem:[%s1456_s28 + $0x20] sm:$0xff] %v653_v29  ;;  %v656_v33 = vadd.f32 %v851_v17, %v655_v32 }
 0x24a   : > { %706 = vst [vmem:[%s1456_s28 + $0x38] sm:$0xff] %v664_v31 }
 0x24b   : > { %704 = vst [vmem:[%s1456_s28 + $0x28] sm:$0xff] %v656_v33 }
 0x24d   : > { %v957_v34 = vpop.f32.mrb[8].mxu1 }
 0x24e   : > { %v677_v35 = vadd.f32 %v957_v34, %v851_v17  ;;  %v668_v36 = vpop.f32.mrb[9].mxu1 }
 0x24f   : > { %v669_v37 = vadd.f32 %v851_v17, %v668_v36  ;;  %v958_v38 = vpop.f32.mrb[10].mxu1 }
 0x250   : > { %709 = vst [vmem:[%s1456_s28 + $0x50] sm:$0xff] %v677_v35  ;;  %v680_v39 = vadd.f32 %v958_v38, %v851_v17  ;;  %v671_v40 = vpop.f32.mrb[11].mxu1 }
 0x251   : > { %707 = vst [vmem:[%s1456_s28 + $0x40] sm:$0xff] %v669_v37  ;;  %v672_v41 = vadd.f32 %v851_v17, %v671_v40 }
 0x252   : > { %710 = vst [vmem:[%s1456_s28 + $0x58] sm:$0xff] %v680_v39 }
 0x253   : > { %708 = vst [vmem:[%s1456_s28 + $0x48] sm:$0xff] %v672_v41 }
 0x255   : > { %v961_v42 = vpop.f32.mrb[12].mxu1 }
 0x256   : > { %v693_v43 = vadd.f32 %v961_v42, %v851_v17  ;;  %v684_v44 = vpop.f32.mrb[13].mxu1 }
 0x257   : > { %v685_v45 = vadd.f32 %v851_v17, %v684_v44  ;;  %v962_v46 = vpop.f32.mrb[14].mxu1 }
 0x258   : > { %713 = vst [vmem:[%s1456_s28 + $0x70] sm:$0xff] %v693_v43  ;;  %v696_v47 = vadd.f32 %v962_v46, %v851_v17  ;;  %v687_v48 = vpop.f32.mrb[15].mxu1 }
 0x259   : > { %711 = vst [vmem:[%s1456_s28 + $0x60] sm:$0xff] %v685_v45  ;;  %v688_v49 = vadd.f32 %v851_v17, %v687_v48 }
 0x25a   : > { %714 = vst [vmem:[%s1456_s28 + $0x78] sm:$0xff] %v696_v47 }
 0x25b   : > { %712 = vst [vmem:[%s1456_s28 + $0x68] sm:$0xff] %v688_v49 }
 0x25c   : > { %1157 = shalt.err (!%p1154_p7)
}
 0x25d   : > { %s1158_s24 = scalar_lea.hbm %s1476_s17, 2048  ;;  %s1162_s16 = scalar_lea.hbm %s1529_s5, 6144 }
 0x25e   : > { %p1159_p9 = scmp.ne.s32.totalorder %s1476_s17, %s1158_s24  ;;  %p1163_p5 = scmp.lt.u32.totalorder %s1476_s17, %s1529_s5 }
 0x25f   : > { %p1164_p10 = scmp.lt.u32.totalorder %s1162_s16, %s1158_s24  ;;  %p1166_p2 = scmp.lt.u32.totalorder %s1158_s24, %s1476_s17 }
 0x260   : > { %p1160_p12 = pnand %p1159_p9, %p1372_p6 }
 0x261   : > { %p1165_p1 = por %p1164_p10, %p1163_p5 }
 0x262   : > { %p1161_p0 = pneg %p1160_p12 }
 0x263   : > { %p1167_p4 = por %p1166_p2, %p1165_p1 }
 0x265   : > { %p1168_p8 = pnand %p1167_p4, %p1161_p0 }
 0x267   : > { %1171 = shalt.err (!%p1168_p8)
}
 0x268   : > { %s1222_s12 = smov 128   ;;  %s1223_s30 = smov 8  }
 0x269   : > { %973 = dma.vmem_to_hbm [thread:$0]  (%p1372_p6), %s1478_s13, 2048, %s1476_s17, %s716_s22, %s1222_s12, %s1222_s12, %s1223_s30  }
 0x26a PF: > { %p995_p11 = scmp.ge.s32.totalorder %s1214_s21, 2  ;;  %s744_s11 = sand.u32 1, %s1202_s18  }
 0x26b   : > { %p1544_p13 = scmp.ne.s32.totalorder %s1534_s25, 0  ;;  %s745_s7 = scalar_lea.sflag [#allocation4], %s744_s11 }
 0x26d   : > { %p987_p3 = pnand %p995_p11, %p1544_p13 }
 0x26f   : > { %1197 = dma.done.wait (!%p987_p3), %s745_s7, 2048  }
 0x270   : > { %1199 = vsyncadd (!%p987_p3), %s745_s7, 4294965248  ;;  %p19_p7 = scmp.ge.s32.totalorder %s1362_s29, 5   ;;  %s1545_s18 = smov %s1206_s19 }
 0x271   : > { %s1546_s19 = smov %s1210_s20  ;;  %s1547_s20 = smov %s1378_s27 }
 0x272   : > { %s1548_s21 = smov %s1362_s29  ;;  %21 = sbr.rel (!%p19_p7) target bundleno = 6 (0x6), region = 93 }
 0x279   :  { %750 = vsyncpa [#allocation3], 1 }
 0x27a   :  { %752 = vsyncpa [#allocation3 + $0x1], 1 }
 0x27b   :  { %753 = vsyncpa [#allocation6], 1 }
 0x27c   :  { %754 = vsyncpa [#allocation4], 1 }
 0x27d   :  { %756 = vsyncpa [#allocation4 + $0x1], 1 }

</bundles_post_ra>
